<compile_context>
chip_gen: v5e
topology: v5e:2x2
jax: 0.10.0
libtpu: 0.0.40
codegen_flags: <defaults>
</compile_context>

<pallas_src>
import jax
import jax.numpy as jnp
from jax.experimental import pallas as pl
from jax.experimental.pallas import tpu as pltpu


# ---------------------------------------------------------------------------
# helpers
# ---------------------------------------------------------------------------
def _round_up(x, m):
    return ((x + m - 1) // m) * m


def _halve_aligned(t, align):
    return max(align, ((t // 2) // align) * align)


def _sublane_align(dtype):
    # Sub-32-bit dtypes pack along sublanes: 8 rows for 4B, 16 for 2B, 32 for 1B.
    return max(8, 32 // jnp.dtype(dtype).itemsize)


def _vmem_budget_bytes():
    phys = 128 * 1024 * 1024
    try:
        info = pltpu.get_tpu_info()
        phys = int(getattr(info, "vmem_capacity_bytes", phys))
    except Exception:
        pass
    if phys <= 64 * 1024 * 1024:
        return 44 * 1024 * 1024   # v7x: 64 MiB physical per TC, leave headroom
    return 96 * 1024 * 1024       # v5e / v6e: 128 MiB physical


def _footprint_bytes(tm, tn, tk, in_isz, out_isz, use_scratch):
    buf = 2 * (tm * tk + tk * tn) * in_isz   # double-buffered x / w tiles
    buf += 2 * tn * in_isz                   # bias tile (tiny)
    buf += 2 * tm * tn * out_isz             # output tile
    if use_scratch:
        buf += tm * tn * 4                   # resident f32 accumulator
    return buf


# ---------------------------------------------------------------------------
# kernels
# ---------------------------------------------------------------------------
def _linear_kernel_resident_out(x_ref, w_ref, b_ref, o_ref):
    """f32 output: accumulate directly into the resident output tile."""
    k = pl.program_id(2)
    partial = jnp.dot(x_ref[...], w_ref[...], preferred_element_type=jnp.float32)

    @pl.when(k == 0)
    def _():
        o_ref[...] = partial            # first-step overwrite (no zero-init RMW)

    @pl.when(k != 0)
    def _():
        o_ref[...] += partial

    @pl.when(k == pl.num_programs(2) - 1)
    def _():
        o_ref[...] += b_ref[...].astype(jnp.float32)


def _linear_kernel_acc(x_ref, w_ref, b_ref, o_ref, acc_ref):
    """Narrow output dtype: accumulate in f32 scratch, cast once in epilogue."""
    k = pl.program_id(2)
    partial = jnp.dot(x_ref[...], w_ref[...], preferred_element_type=jnp.float32)

    @pl.when(k == 0)
    def _():
        acc_ref[...] = partial

    @pl.when(k != 0)
    def _():
        acc_ref[...] += partial

    @pl.when(k == pl.num_programs(2) - 1)
    def _():
        o_ref[...] = (acc_ref[...] + b_ref[...].astype(jnp.float32)).astype(o_ref.dtype)


# ---------------------------------------------------------------------------
# wrapper
# ---------------------------------------------------------------------------
def linear(x, w, b, *, tm=None, tn=None, tk=None):
    M, K = x.shape
    K2, N = w.shape
    assert K == K2 and b.shape == (N,)

    out_dtype = x.dtype
    in_isz = jnp.dtype(x.dtype).itemsize
    out_isz = jnp.dtype(out_dtype).itemsize
    resident_out = jnp.dtype(out_dtype) == jnp.dtype(jnp.float32)
    use_scratch = not resident_out
    sub_align = _sublane_align(x.dtype)

    budget = _vmem_budget_bytes()

    # Near-square output tiles; bigger target when operands are narrow and
    # there is VMEM headroom (v5e/v6e).
    target_mn = 1536 if (budget >= 96 * 1024 * 1024 and in_isz <= 2) else 1024
    target_k = 512

    if tm is None:
        tm = min(target_mn, _round_up(M, sub_align))
    if tn is None:
        tn = min(target_mn, _round_up(N, 128))
    if tk is None:
        tk = min(target_k, _round_up(K, 128))

    # Shrink until the working set fits the per-generation VMEM budget
    # (tk first: it does not change streamed HBM traffic; then larger of tm/tn).
    while _footprint_bytes(tm, tn, tk, in_isz, out_isz, use_scratch) > budget:
        if tk > 256:
            tk = _halve_aligned(tk, 128)
        elif tn >= tm and tn > 128:
            tn = _halve_aligned(tn, 128)
        elif tm > sub_align:
            tm = _halve_aligned(tm, sub_align)
        elif tk > 128:
            tk = _halve_aligned(tk, 128)
        else:
            break

    # Megacore: ensure at least 2 blocks along some parallel axis when possible
    # (v7x has 2 TensorCores; v5e/v6e are unaffected).
    def _nblocks(d, t):
        return _round_up(d, t) // t

    if _nblocks(M, tm) * _nblocks(N, tn) == 1:
        if N > 128 and tn > 128:
            tn = max(128, _round_up((N + 1) // 2, 128))
        elif M > sub_align and tm > sub_align:
            tm = max(sub_align, _round_up((M + 1) // 2, sub_align))

    # (8, 128) tiling rule.
    assert tm % sub_align == 0 and tm % 8 == 0
    assert tn % 128 == 0 and tk % 128 == 0

    # Pad to tile multiples (zero K-padding contributes nothing to the matmul).
    Mp, Np, Kp = _round_up(M, tm), _round_up(N, tn), _round_up(K, tk)
    xp = x if (Mp, Kp) == (M, K) else jnp.pad(x, ((0, Mp - M), (0, Kp - K)))
    wp = w if (Kp, Np) == (K, N) else jnp.pad(w, ((0, Kp - K), (0, Np - N)))
    bp = b if Np == N else jnp.pad(b, (0, Np - N))
    b2d = bp.reshape(1, Np)

    grid = (Mp // tm, Np // tn, Kp // tk)

    # Advisory cost estimate reflecting actual streamed traffic:
    # x is re-read once per N-tile, w once per M-tile, output written once.
    cost = pl.CostEstimate(
        flops=2 * Mp * Np * Kp,
        transcendentals=0,
        bytes_accessed=(Mp * Kp * grid[1] + Kp * Np * grid[0] + Np) * in_isz
        + Mp * Np * out_isz,
    )

    kernel = _linear_kernel_resident_out if resident_out else _linear_kernel_acc
    scratch = [] if resident_out else [pltpu.VMEM((tm, tn), jnp.float32)]

    out = pl.pallas_call(
        kernel,
        out_shape=jax.ShapeDtypeStruct((Mp, Np), out_dtype),
        grid_spec=pltpu.PrefetchScalarGridSpec(
            num_scalar_prefetch=0,
            grid=grid,
            in_specs=[
                pl.BlockSpec((tm, tk), lambda i, j, k: (i, k)),   # x tile
                pl.BlockSpec((tk, tn), lambda i, j, k: (k, j)),   # w tile
                pl.BlockSpec((1, tn), lambda i, j, k: (0, j)),    # bias tile
            ],
            out_specs=pl.BlockSpec((tm, tn), lambda i, j, k: (i, j)),
            scratch_shapes=scratch,
        ),
        compiler_params=pltpu.CompilerParams(
            dimension_semantics=("parallel", "parallel", "arbitrary"),
            vmem_limit_bytes=budget,
        ),
        cost_estimate=cost,
    )(xp, wp, b2d)

    if (Mp, Np) != (M, N):
        out = out[:M, :N]
    return out


# ---------------------------------------------------------------------------
# test
# ---------------------------------------------------------------------------
if __name__ == "__main__":
    # Small deterministic shapes consistent with the module: x [batch, in_features].
    batch, in_features, out_features = 8, 32, 128

    key = jax.random.PRNGKey(0)
    kx, kw, kb = jax.random.split(key, 3)
    x = jax.random.normal(kx, (batch, in_features), dtype=jnp.float32)
    w = jax.random.normal(kw, (in_features, out_features), dtype=jnp.float32)
    b = jax.random.normal(kb, (out_features,), dtype=jnp.float32)

    out = linear(x, w, b)
    out = jax.block_until_ready(out)

    ref = x @ w + b
    assert out.shape == (batch, out_features)
    assert jnp.allclose(out, ref, atol=1e-5, rtol=1e-5)

    print("KERNEL_OK")
</pallas_src>

<mosaic_0001>
module attributes {stable_mosaic.version = 11 : i64} {
  func.func @_linear_kernel_resident_out(%arg0: i32, %arg1: i32, %arg2: i32, %arg3: memref<8x128xf32, #tpu.memory_space<vmem>>, %arg4: memref<128x128xf32, #tpu.memory_space<vmem>>, %arg5: memref<1x128xf32, #tpu.memory_space<vmem>>, %arg6: memref<8x128xf32, #tpu.memory_space<vmem>>) attributes {dimension_semantics = [#tpu.dimension_semantics<parallel>, #tpu.dimension_semantics<parallel>, #tpu.dimension_semantics<arbitrary>], iteration_bounds = array<i64: 1, 1, 1>, scalar_prefetch = 0 : i64, scratch_operands = 0 : i64, tpu.core_type = #tpu.core_type<tc>, window_params = [{transform_indices = @transform_0, window_bounds = array<i64: 8, 128>}, {transform_indices = @transform_1, window_bounds = array<i64: 128, 128>}, {transform_indices = @transform_2, window_bounds = array<i64: 1, 128>}, {transform_indices = @transform_3, window_bounds = array<i64: 8, 128>}]} {
    %c0 = arith.constant 0 : index
    %c0_0 = arith.constant 0 : index
    %0 = vector.load %arg3[%c0, %c0_0] : memref<8x128xf32, #tpu.memory_space<vmem>>, vector<8x128xf32>
    %c0_1 = arith.constant 0 : index
    %c0_2 = arith.constant 0 : index
    %1 = vector.load %arg4[%c0_1, %c0_2] : memref<128x128xf32, #tpu.memory_space<vmem>>, vector<128x128xf32>
    %cst = arith.constant dense<0.000000e+00> : vector<8x128xf32>
    %2 = tpu.matmul %0, %1, %cst {dimension_numbers = #tpu.dot_dimension_numbers<[1], [0], [0], [1], [0, 0, 1, 1], [], []>} : vector<8x128xf32>, vector<128x128xf32>, vector<8x128xf32> -> vector<8x128xf32>
    %c0_i32 = arith.constant 0 : i32
    %3 = arith.cmpi eq, %arg2, %c0_i32 : i32
    %4 = arith.extui %3 : i1 to i32
    %c0_i32_3 = arith.constant 0 : i32
    %5 = arith.cmpi ne, %4, %c0_i32_3 : i32
    scf.if %5 {
      %c0_8 = arith.constant 0 : index
      %c0_9 = arith.constant 0 : index
      %12 = vector.load %arg6[%c0_8, %c0_9] : memref<8x128xf32, #tpu.memory_space<vmem>>, vector<8x128xf32>
      tpu.vector_store %arg6[%c0_8, %c0_9], %2 {strides = array<i32>} : memref<8x128xf32, #tpu.memory_space<vmem>>, vector<8x128xf32>,
    } else {
    }
    %c0_i32_4 = arith.constant 0 : i32
    %6 = arith.cmpi ne, %arg2, %c0_i32_4 : i32
    %7 = arith.extui %6 : i1 to i32
    %c0_i32_5 = arith.constant 0 : i32
    %8 = arith.cmpi ne, %7, %c0_i32_5 : i32
    scf.if %8 {
      %c0_8 = arith.constant 0 : index
      %c0_9 = arith.constant 0 : index
      %12 = vector.load %arg6[%c0_8, %c0_9] : memref<8x128xf32, #tpu.memory_space<vmem>>, vector<8x128xf32>
      %13 = arith.addf %12, %2 : vector<8x128xf32>
      %c0_10 = arith.constant 0 : index
      %c0_11 = arith.constant 0 : index
      %14 = vector.load %arg6[%c0_10, %c0_11] : memref<8x128xf32, #tpu.memory_space<vmem>>, vector<8x128xf32>
      tpu.vector_store %arg6[%c0_10, %c0_11], %13 {strides = array<i32>} : memref<8x128xf32, #tpu.memory_space<vmem>>, vector<8x128xf32>,
    } else {
    }
    %c0_i32_6 = arith.constant 0 : i32
    %9 = arith.cmpi eq, %arg2, %c0_i32_6 : i32
    %10 = arith.extui %9 : i1 to i32
    %c0_i32_7 = arith.constant 0 : i32
    %11 = arith.cmpi ne, %10, %c0_i32_7 : i32
    scf.if %11 {
      %c0_8 = arith.constant 0 : index
      %c0_9 = arith.constant 0 : index
      %12 = vector.load %arg6[%c0_8, %c0_9] : memref<8x128xf32, #tpu.memory_space<vmem>>, vector<8x128xf32>
      %c0_10 = arith.constant 0 : index
      %c0_11 = arith.constant 0 : index
      %13 = vector.load %arg5[%c0_10, %c0_11] : memref<1x128xf32, #tpu.memory_space<vmem>>, vector<1x128xf32>
      %14 = vector.broadcast %13 : vector<1x128xf32> to vector<8x128xf32>
      %15 = arith.addf %12, %14 : vector<8x128xf32>
      %c0_12 = arith.constant 0 : index
      %c0_13 = arith.constant 0 : index
      %16 = vector.load %arg6[%c0_12, %c0_13] : memref<8x128xf32, #tpu.memory_space<vmem>>, vector<8x128xf32>
      tpu.vector_store %arg6[%c0_12, %c0_13], %15 {strides = array<i32>} : memref<8x128xf32, #tpu.memory_space<vmem>>, vector<8x128xf32>,
    } else {
    }
    return
  }
  func.func @transform_0(%arg0: i32, %arg1: i32, %arg2: i32) -> (i32, i32) {
    %c0_i32 = arith.constant 0 : i32
    return %arg0, %arg2 : i32, i32
  }
  func.func @transform_1(%arg0: i32, %arg1: i32, %arg2: i32) -> (i32, i32) {
    %c0_i32 = arith.constant 0 : i32
    return %arg2, %arg1 : i32, i32
  }
  func.func @transform_2(%arg0: i32, %arg1: i32, %arg2: i32) -> (i32, i32) {
    %c0_i32 = arith.constant 0 : i32
    %c0_i32_0 = arith.constant 0 : i32
    return %c0_i32, %arg1 : i32, i32
  }
  func.func @transform_3(%arg0: i32, %arg1: i32, %arg2: i32) -> (i32, i32) {
    %c0_i32 = arith.constant 0 : i32
    return %arg0, %arg1 : i32, i32
  }
}

</mosaic_0001>

<bundles_post_ra>
// kernel: tpu_custom_call.1
= control target key start
LH: loop header
LB: loop body
LE: loop exit
PB: predicated region body
PF: predicated region fallthrough
CT: control target
= control target key end

     0   :  { %8 = vsyncpa [#allocation3], 0  ;;  %s243_s0 = inlined_call_operand.hbm [shape: f32[8,128], index: 0, kind: input, shape index: {}]   ;;  %s244_s1 = inlined_call_operand.hbm [shape: f32[128,128], index: 1, kind: input, shape index: {}]   ;;  %s245_s2 = inlined_call_operand.vmem [shape: f32[1,128], index: 2, kind: input, shape index: {}]   ;;  %s246_s3 = inlined_call_operand.hbm [shape: f32[8,128], index: 3, kind: output, shape index: {}]  }
   0x1   :  { %9 = vsyncpa [#allocation6], 0 }
   0x2   :  { %10 = vsyncpa [#allocation4], 0  ;;  %s16_s14 = sshll.u32 %s243_s0, 4  ;;  %s206_s15 = smov [#allocation2]   ;;  %s17_s14 = int_to_ptr.hbm [resolvable:$true] %s16_s14 }
   0x3   :  { %s18_s16 = sshll.u32 %s206_s15, 4  ;;  %s26_s19 = sshll.u32 %s244_s1, 4  ;;  %s19_s16 = int_to_ptr.vmem [resolvable:$true] %s18_s16  ;;  %s27_s19 = int_to_ptr.hbm [resolvable:$true] %s26_s19 }
   0x4   :  { %21 = dma.hbm_to_vmem [thread:$0]  %s17_s14, 128, %s19_s16, [#allocation3]  }
   0x5   :  { %s207_s20 = smov [#allocation5]   ;;  %s208_s22 = smov 128  }
   0x6   :  { %s28_s21 = sshll.u32 %s207_s20, 4  ;;  %s209_s23 = smov 8   ;;  %s29_s21 = int_to_ptr.vmem [resolvable:$true] %s28_s21 }
   0x7   :  { %34 = dma.hbm_to_vmem [thread:$0]  %s27_s19, 2048, %s29_s21, [#allocation6], %s208_s22, %s208_s22, %s209_s23  }
   0x8   :  { %200 = dma.done.wait [#allocation3], 128  }
   0x9   :  { %201 = vsyncadd [#allocation3], 4294967168 }
   0xa   :  { %202 = dma.done.wait [#allocation6], 2048  }
   0xb   :  { %203 = vsyncadd [#allocation6], 4294965248  ;;  %v61_v0 = vld [vmem:[#allocation5 + $0x78] sm:$0xff]  ;;  %v60_v1 = vld [vmem:[#allocation5 + $0x70] sm:$0xff]  ;;  %s210_s24 = smov [#allocation7]   ;;  %s111_s28 = sshll.u32 %s246_s3, 4  ;;  %s112_s28 = int_to_ptr.hbm [resolvable:$true] %s111_s28 }
   0xc   :  { %62 = vmatpush.msra.mxu0 %v61_v0  ;;  %v59_v2 = vld [vmem:[#allocation5 + $0x68] sm:$0xff]  ;;  %v58_v3 = vld [vmem:[#allocation5 + $0x60] sm:$0xff]  ;;  %v57_v4 = vld [vmem:[#allocation5 + $0x58] sm:$0xff]  ;;  %s109_s25 = sshll.u32 %s210_s24, 4  ;;  %s110_s25 = int_to_ptr.vmem [resolvable:$true] %s109_s25 }
   0xd   :  { %v56_v5 = vld [vmem:[#allocation5 + $0x50] sm:$0xff]  ;;  %v55_v6 = vld [vmem:[#allocation5 + $0x48] sm:$0xff]  ;;  %v54_v7 = vld [vmem:[#allocation5 + $0x40] sm:$0xff] }
   0xe   :  { %63 = vmatpush.msra.mxu0 %v60_v1  ;;  %v53_v8 = vld [vmem:[#allocation5 + $0x38] sm:$0xff]  ;;  %v52_v9 = vld [vmem:[#allocation5 + $0x30] sm:$0xff]  ;;  %v51_v10 = vld [vmem:[#allocation5 + $0x28] sm:$0xff] }
   0xf   :  { %v50_v11 = vld [vmem:[#allocation5 + $0x20] sm:$0xff]  ;;  %v49_v12 = vld [vmem:[#allocation5 + $0x18] sm:$0xff]  ;;  %v48_v13 = vld [vmem:[#allocation5 + $0x10] sm:$0xff] }
  0x10   :  { %64 = vmatpush.msra.mxu0 %v59_v2  ;;  %v47_v14 = vld [vmem:[#allocation5 + $0x8] sm:$0xff]  ;;  %v46_v15 = vld [vmem:[#allocation5] sm:$0xff]  ;;  %v45_v16 = vld [vmem:[#allocation2] sm:$0xff] }
  0x11   :  { %v127_v17 = vld [vmem:[%s245_s2] ss:$0 sm:$0xff] }
  0x12   :  { %65 = vmatpush.msra.mxu0 %v58_v3 }
  0x14   :  { %66 = vmatpush.msra.mxu0 %v57_v4 }
  0x16   :  { %67 = vmatpush.msra.mxu0 %v56_v5 }
  0x18   :  { %68 = vmatpush.msra.mxu0 %v55_v6 }
  0x1a   :  { %69 = vmatpush.msra.mxu0 %v54_v7 }
  0x1c   :  { %70 = vmatpush.msra.mxu0 %v53_v8 }
  0x1e   :  { %71 = vmatpush.msra.mxu0 %v52_v9 }
  0x20   :  { %72 = vmatpush.msra.mxu0 %v51_v10 }
  0x22   :  { %73 = vmatpush.msra.mxu0 %v50_v11 }
  0x24   :  { %74 = vmatpush.msra.mxu0 %v49_v12 }
  0x26   :  { %75 = vmatpush.msra.mxu0 %v48_v13 }
  0x28   :  { %76 = vmatpush.msra.mxu0 %v47_v14 }
  0x2a   :  { %77 = vmatpush.msra.mxu0 %v46_v15 }
  0x2b   :  { %78 = vmatmul.f32.vlgmr.msra.gmra.mxu0 %v45_v16 }
  0xa8   :  { %v79_v18 = vpop.f32.mrf.mxu0 }
  0xa9   :  { %v102_v19 = vadd.f32 %v127_v17, %v79_v18 }
  0xab   :  { %103 = vst [vmem:[#allocation7] sm:$0xff] %v102_v19 }
  0xac   :  { %114 = dma.vmem_to_hbm [thread:$0]  %s110_s25, 128, %s112_s28, [#allocation4]  }
  0xad   :  { %204 = dma.done.wait [#allocation4], 128  }
  0xae   :  { %205 = vsyncadd [#allocation4], 4294967168 }
  0xaf   :  { %119 = vsyncpa [#allocation3], 1 }
  0xb0   :  { %120 = vsyncpa [#allocation6], 1 }
  0xb1   :  { %121 = vsyncpa [#allocation4], 1 }

</bundles_post_ra>
